<compile_context>
chip_gen: v5e
topology: v5e:2x2
jax: 0.10.0
libtpu: 0.0.40
codegen_flags: <defaults>
</compile_context>

<pallas_src>
import jax
import jax.numpy as jnp
from jax.experimental import pallas as pl
from jax.experimental.pallas import tpu as pltpu

MiB = 1024 * 1024


# ----------------------------- parameter setup (glue) -----------------------------

def precompute_cos_sin(dim: int, end: int, theta: float = 10000.0):
    """Precompute (cos, sin) tables of shape (end, dim), identical to the torch code."""
    inv_freq = 1.0 / (theta ** (jnp.arange(0, dim, 2, dtype=jnp.float32) / dim))
    t = jnp.arange(end, dtype=jnp.float32)
    freqs = jnp.outer(t, inv_freq)                      # (end, dim//2)
    emb = jnp.concatenate([freqs, freqs], axis=-1)      # (end, dim)
    return jnp.cos(emb), jnp.sin(emb)


# ----------------------------- Pallas kernel ---------------------------------------

def _rope_kernel(cos_ref, sins_ref, q_ref, k_ref, qo_ref, ko_ref):
    # Two layouts share this body (trace-time branch on rank):
    #   rows layout : cos/sins (tR, D),  q/k (tR, D)       -- same-shape elementwise
    #   heads layout: cos/sins (tS, D),  q/k (tS, H, D)    -- broadcast tables over H
    D = q_ref.shape[-1]
    half = D // 2
    assert half * 2 == D, "d_head must be even"

    cos = cos_ref[...]
    sin_s = sins_ref[...]       # sin with rotate_half's sign pre-folded in
    if len(q_ref.shape) == 3:   # heads layout: broadcast tables over the head dim
        cos = cos[:, None, :]
        sin_s = sin_s[:, None, :]

    def swap_halves(x):
        # concat(x2, x1); the "-x2" sign of rotate_half lives in sin_s.
        if D % 128 == 0:
            # NOTE: only valid because shift == D//2, which is direction-symmetric
            # (roll by +D/2 == roll by -D/2).  Any other shift breaks the
            # pre-signed-sin scheme.  XLU slot -> effectively free vs. VPU/vst.
            return pltpu.roll(x, shift=half, axis=x.ndim - 1)
        # TODO(synk): D < 128 head dims leave lane-padded (masked) stores; if such
        # head dims matter in production, merge (H, D) -> H*D in the wrapper for
        # lane density.  This fallback is correct but ~2-4x slower per byte.
        return jnp.concatenate([x[..., half:], x[..., :half]], axis=-1)

    q = q_ref[...]
    k = k_ref[...]

    qo_ref[...] = (q * cos + swap_halves(q) * sin_s).astype(qo_ref.dtype)
    ko_ref[...] = (k * cos + swap_halves(k) * sin_s).astype(ko_ref.dtype)


# ----------------------------- wrapper ---------------------------------------------

class RealRotaryPE:
    """Real-valued RoPE positional encoder (Pallas TPU implementation)."""

    # per-step size below which we fold batch into the row axis (decode shapes)
    _MIN_STEP_BYTES = 2 * MiB

    def __init__(self, d_head: int, max_sequence_length: int = 2048,
                 rope_theta: float = 10000.0):
        assert d_head % 2 == 0, "d_head must be even for rotate_half"
        self.d_head = d_head
        self.max_sequence_length = max_sequence_length
        self.rope_theta = rope_theta
        self.cos_cached, self.sin_cached = precompute_cos_sin(
            d_head, max_sequence_length, rope_theta)
        # Pre-signed sin:  rotate_half(x) * sin == concat(x2, x1) * sin_signed
        # with sign = [-1]*(D/2) ++ [+1]*(D/2), folded once at init (free).
        sign = jnp.concatenate([
            -jnp.ones((d_head // 2,), jnp.float32),
            jnp.ones((d_head // 2,), jnp.float32),
        ])
        self.sin_signed = self.sin_cached * sign[None, :]
        # Memoized per-(seq_len, dtype, layout, H, fold_B) cast/expanded tables,
        # so repeated calls don't re-slice / re-cast / re-expand.
        self._table_cache = {}

    # ----- VMEM budget (per generation) -----
    @staticmethod
    def _vmem_budget():
        try:
            vmem_cap = int(pltpu.get_tpu_info().vmem_capacity_bytes)
        except Exception:
            vmem_cap = 64 * MiB          # v7x-safe fallback (smallest VMEM per TC)
        # v7x (64 MiB physical) -> 48 MiB scoped; v5e/v6e (128 MiB) -> 64 MiB.
        vmem_limit = min((3 * vmem_cap) // 4, 64 * MiB)
        block_budget = max(vmem_limit - 8 * MiB, 8 * MiB)   # headroom for scratch
        return vmem_limit, block_budget

    def _tables(self, S, dtype, layout, H, fold_B):
        key = (S, jnp.dtype(dtype).name, layout, H, fold_B)
        if key not in self._table_cache:
            cos = self.cos_cached[:S].astype(dtype)       # (S, D)
            sin_s = self.sin_signed[:S].astype(dtype)     # (S, D)
            if layout == "rows":
                # expand per head so table rows line up with (B, S*H, D) data rows
                cos = jnp.repeat(cos, H, axis=0)           # (S*H, D)
                sin_s = jnp.repeat(sin_s, H, axis=0)
                if fold_B > 1:                             # decode-style batch fold
                    cos = jnp.tile(cos, (fold_B, 1))       # (B*S*H, D)
                    sin_s = jnp.tile(sin_s, (fold_B, 1))
            self._table_cache[key] = (cos, sin_s)
        return self._table_cache[key]

    def __call__(self, q: jax.Array, k: jax.Array, *, layout: str = "auto",
                 donate_qk: bool = False):
        B, S, H, D = q.shape
        assert k.shape == (B, S, H, D)
        assert D == self.d_head
        assert S <= self.cos_cached.shape[0], (
            f"seq_len {S} > max_seq_len {self.cos_cached.shape[0]}")

        # Compute in the input dtype (HF semantics; bf16 I/O halves HBM traffic,
        # which dominates on every generation — never upcast q/k here).
        dtype = q.dtype
        itemsize = jnp.dtype(dtype).itemsize
        sublane_min = max(8, 32 // itemsize)        # 8 (f32), 16 (bf16), 32 (i8)

        vmem_limit, block_budget = self._vmem_budget()
        slab_bytes = S * H * D * itemsize           # one batch's worth of one tensor

        # ----- layout selection -----
        fold_small = (B > 1) and (slab_bytes < self._MIN_STEP_BYTES)
        if layout == "auto":
            # rows layout when the head axis would sublane-pad, or when per-batch
            # slabs are too small to amortize the ~0.35 us per-grid-step overhead.
            layout = "rows" if (H < sublane_min or fold_small) else "heads"
        assert layout in ("rows", "heads")

        fold_B = B if (layout == "rows" and fold_small) else 1

        if layout == "rows":
            R = S * H
            if fold_B > 1:
                data_q = q.reshape(1, B * R, D)
                data_k = k.reshape(1, B * R, D)
                Bp, total_rows = 1, B * R
            else:
                data_q = q.reshape(B, R, D)
                data_k = k.reshape(B, R, D)
                Bp, total_rows = B, R
            width_bytes = D * itemsize
            # resident: 4 data blocks + 2 table blocks (same size), x2 buffers
            denom = 12
        else:  # heads layout
            data_q, data_k = q, k
            Bp, total_rows = B, S
            width_bytes = H * D * itemsize
            # resident: 4 data blocks x2 buffers; tables are ~1/H of a data block
            denom = 9

        # ----- tile size: biggest that fits the VMEM budget (no artificial cap) -----
        per_tensor = block_budget // denom
        t_rows = (per_tensor // width_bytes) // sublane_min * sublane_min
        t_rows = max(sublane_min, t_rows)
        t_rows = min(t_rows, total_rows)            # full-extent block for small inputs
        num_tiles = pl.cdiv(total_rows, t_rows)     # padded last block OK (elementwise)

        # Row axis leading (larger/even -> good megacore split on v7x); batch inner
        # so the table block index is constant across inner steps (no re-DMA).
        grid = (num_tiles, Bp)

        if layout == "rows":
            data_spec = pl.BlockSpec((None, t_rows, D), lambda r, b: (b, r, 0))
        else:
            data_spec = pl.BlockSpec((None, t_rows, H, D), lambda r, b: (b, r, 0, 0))
        tbl_spec = pl.BlockSpec((t_rows, D), lambda r, b: (r, 0))

        cos_t, sin_t = self._tables(S, dtype, layout, H, fold_B)

        extra = {}
        if donate_qk:
            # Apply RoPE "in place" when the caller can donate q/k (saves the
            # output allocation / copy when fused into a larger graph).
            extra["input_output_aliases"] = {2: 0, 3: 1}

        qo, ko = pl.pallas_call(
            _rope_kernel,
            out_shape=(
                jax.ShapeDtypeStruct(data_q.shape, q.dtype),
                jax.ShapeDtypeStruct(data_k.shape, k.dtype),
            ),
            grid=grid,
            in_specs=[tbl_spec, tbl_spec, data_spec, data_spec],
            out_specs=(data_spec, data_spec),
            compiler_params=pltpu.CompilerParams(
                dimension_semantics=("parallel", "parallel"),
                vmem_limit_bytes=vmem_limit,
            ),
            **extra,
        )(cos_t, sin_t, data_q, data_k)

        return qo.reshape(B, S, H, D), ko.reshape(B, S, H, D)


# ----------------------------- reference (pure JAX) for verification ----------------

def _rotate_half_ref(x):
    half = x.shape[-1] // 2
    return jnp.concatenate([-x[..., half:], x[..., :half]], axis=-1)


def _rope_ref(q, k, cos, sin):
    cos = cos[None, :, None, :]
    sin = sin[None, :, None, :]
    q_embed = q * cos + _rotate_half_ref(q) * sin
    k_embed = k * cos + _rotate_half_ref(k) * sin
    return q_embed, k_embed


# ----------------------------- main --------------------------------------------------

if __name__ == "__main__":
    key = jax.random.PRNGKey(0)
    max_seq = 64

    # --- 1) f32, D=128: auto layout (rows + batch fold), pltpu.roll path ---
    B, S, H, D = 2, 8, 4, 128
    kq, kk = jax.random.split(key)
    q = jax.random.normal(kq, (B, S, H, D), dtype=jnp.float32)
    k = jax.random.normal(kk, (B, S, H, D), dtype=jnp.float32)

    rope = RealRotaryPE(d_head=D, max_sequence_length=max_seq, rope_theta=10000.0)
    q_out, k_out = rope(q, k)
    jax.block_until_ready((q_out, k_out))

    q_ref, k_ref = _rope_ref(q, k, rope.cos_cached[:S], rope.sin_cached[:S])
    assert jnp.allclose(q_out, q_ref, atol=1e-5, rtol=1e-5)
    assert jnp.allclose(k_out, k_ref, atol=1e-5, rtol=1e-5)

    # --- 2) f32, forced "heads" layout (B small, H >= 8): broadcast-over-H path ---
    B2, S2, H2, D2 = 2, 16, 8, 128
    kq2, kk2 = jax.random.split(jax.random.PRNGKey(1))
    q2 = jax.random.normal(kq2, (B2, S2, H2, D2), dtype=jnp.float32)
    k2 = jax.random.normal(kk2, (B2, S2, H2, D2), dtype=jnp.float32)

    q2_out, k2_out = rope(q2, k2, layout="heads")
    jax.block_until_ready((q2_out, k2_out))
    q2_ref, k2_ref = _rope_ref(q2, k2, rope.cos_cached[:S2], rope.sin_cached[:S2])
    assert jnp.allclose(q2_out, q2_ref, atol=1e-5, rtol=1e-5)
    assert jnp.allclose(k2_out, k2_ref, atol=1e-5, rtol=1e-5)

    # --- 3) bf16 production path (pre-signed sin + roll, bf16 accumulate) ---
    q3 = q.astype(jnp.bfloat16)
    k3 = k.astype(jnp.bfloat16)
    q3_out, k3_out = rope(q3, k3)
    jax.block_until_ready((q3_out, k3_out))
    q3_ref, k3_ref = _rope_ref(q3.astype(jnp.float32), k3.astype(jnp.float32),
                               rope.cos_cached[:S], rope.sin_cached[:S])
    assert jnp.allclose(q3_out.astype(jnp.float32), q3_ref, atol=5e-2, rtol=5e-2)
    assert jnp.allclose(k3_out.astype(jnp.float32), k3_ref, atol=5e-2, rtol=5e-2)

    # --- 4) small head dim (D=32): concat fallback path ---
    B4, S4, H4, D4 = 2, 8, 4, 32
    kq4, kk4 = jax.random.split(jax.random.PRNGKey(2))
    q4 = jax.random.normal(kq4, (B4, S4, H4, D4), dtype=jnp.float32)
    k4 = jax.random.normal(kk4, (B4, S4, H4, D4), dtype=jnp.float32)

    rope4 = RealRotaryPE(d_head=D4, max_sequence_length=max_seq, rope_theta=10000.0)
    q4_out, k4_out = rope4(q4, k4)
    jax.block_until_ready((q4_out, k4_out))
    q4_ref, k4_ref = _rope_ref(q4, k4, rope4.cos_cached[:S4], rope4.sin_cached[:S4])
    assert jnp.allclose(q4_out, q4_ref, atol=1e-5, rtol=1e-5)
    assert jnp.allclose(k4_out, k4_ref, atol=1e-5, rtol=1e-5)

    print("KERNEL_OK")
</pallas_src>

<mosaic_0001>
module attributes {stable_mosaic.version = 11 : i64} {
  func.func @_rope_kernel(%arg0: i32, %arg1: i32, %arg2: memref<64x128xf32, #tpu.memory_space<vmem>>, %arg3: memref<64x128xf32, #tpu.memory_space<vmem>>, %arg4: memref<1x64x128xf32, #tpu.memory_space<vmem>>, %arg5: memref<1x64x128xf32, #tpu.memory_space<vmem>>, %arg6: memref<1x64x128xf32, #tpu.memory_space<vmem>>, %arg7: memref<1x64x128xf32, #tpu.memory_space<vmem>>) attributes {dimension_semantics = [#tpu.dimension_semantics<parallel>, #tpu.dimension_semantics<parallel>], iteration_bounds = array<i64: 1, 1>, scalar_prefetch = 0 : i64, scratch_operands = 0 : i64, tpu.core_type = #tpu.core_type<tc>, window_params = [{transform_indices = @transform_0, window_bounds = array<i64: 64, 128>}, {transform_indices = @transform_1, window_bounds = array<i64: 64, 128>}, {transform_indices = @transform_2, window_bounds = array<i64: 1, 64, 128>}, {transform_indices = @transform_3, window_bounds = array<i64: 1, 64, 128>}, {transform_indices = @transform_4, window_bounds = array<i64: 1, 64, 128>}, {transform_indices = @transform_5, window_bounds = array<i64: 1, 64, 128>}]} {
    %c0 = arith.constant 0 : index
    %c0_0 = arith.constant 0 : index
    %0 = vector.load %arg2[%c0, %c0_0] : memref<64x128xf32, #tpu.memory_space<vmem>>, vector<64x128xf32>
    %c0_1 = arith.constant 0 : index
    %c0_2 = arith.constant 0 : index
    %1 = vector.load %arg3[%c0_1, %c0_2] : memref<64x128xf32, #tpu.memory_space<vmem>>, vector<64x128xf32>
    %c0_3 = arith.constant 0 : index
    %c0_4 = arith.constant 0 : index
    %c0_5 = arith.constant 0 : index
    %2 = vector.load %arg4[%c0_3, %c0_4, %c0_5] : memref<1x64x128xf32, #tpu.memory_space<vmem>>, vector<1x64x128xf32>
    %3 = vector.shape_cast %2 : vector<1x64x128xf32> to vector<64x128xf32>
    %c0_6 = arith.constant 0 : index
    %c0_7 = arith.constant 0 : index
    %c0_8 = arith.constant 0 : index
    %4 = vector.load %arg5[%c0_6, %c0_7, %c0_8] : memref<1x64x128xf32, #tpu.memory_space<vmem>>, vector<1x64x128xf32>
    %5 = vector.shape_cast %4 : vector<1x64x128xf32> to vector<64x128xf32>
    %6 = arith.mulf %3, %0 : vector<64x128xf32>
    %c64_i32 = arith.constant 64 : i32
    %7 = tpu.dynamic_rotate %3 by %c64_i32 dim 1 : vector<64x128xf32>, i32 -> vector<64x128xf32>
    %8 = arith.mulf %7, %1 : vector<64x128xf32>
    %9 = arith.addf %6, %8 : vector<64x128xf32>
    %c0_9 = arith.constant 0 : index
    %c0_10 = arith.constant 0 : index
    %c0_11 = arith.constant 0 : index
    %10 = vector.load %arg6[%c0_9, %c0_10, %c0_11] : memref<1x64x128xf32, #tpu.memory_space<vmem>>, vector<1x64x128xf32>
    %11 = vector.shape_cast %10 : vector<1x64x128xf32> to vector<64x128xf32>
    %12 = vector.shape_cast %9 : vector<64x128xf32> to vector<1x64x128xf32>
    tpu.vector_store %arg6[%c0_9, %c0_10, %c0_11], %12 {strides = array<i32>} : memref<1x64x128xf32, #tpu.memory_space<vmem>>, vector<1x64x128xf32>,
    %13 = arith.mulf %5, %0 : vector<64x128xf32>
    %c64_i32_12 = arith.constant 64 : i32
    %14 = tpu.dynamic_rotate %5 by %c64_i32_12 dim 1 : vector<64x128xf32>, i32 -> vector<64x128xf32>
    %15 = arith.mulf %14, %1 : vector<64x128xf32>
    %16 = arith.addf %13, %15 : vector<64x128xf32>
    %c0_13 = arith.constant 0 : index
    %c0_14 = arith.constant 0 : index
    %c0_15 = arith.constant 0 : index
    %17 = vector.load %arg7[%c0_13, %c0_14, %c0_15] : memref<1x64x128xf32, #tpu.memory_space<vmem>>, vector<1x64x128xf32>
    %18 = vector.shape_cast %17 : vector<1x64x128xf32> to vector<64x128xf32>
    %19 = vector.shape_cast %16 : vector<64x128xf32> to vector<1x64x128xf32>
    tpu.vector_store %arg7[%c0_13, %c0_14, %c0_15], %19 {strides = array<i32>} : memref<1x64x128xf32, #tpu.memory_space<vmem>>, vector<1x64x128xf32>,
    return
  }
  func.func @transform_0(%arg0: i32, %arg1: i32) -> (i32, i32) {
    %c0_i32 = arith.constant 0 : i32
    %c0_i32_0 = arith.constant 0 : i32
    return %arg0, %c0_i32 : i32, i32
  }
  func.func @transform_1(%arg0: i32, %arg1: i32) -> (i32, i32) {
    %c0_i32 = arith.constant 0 : i32
    %c0_i32_0 = arith.constant 0 : i32
    return %arg0, %c0_i32 : i32, i32
  }
  func.func @transform_2(%arg0: i32, %arg1: i32) -> (i32, i32, i32) {
    %c0_i32 = arith.constant 0 : i32
    %c0_i32_0 = arith.constant 0 : i32
    return %arg1, %arg0, %c0_i32 : i32, i32, i32
  }
  func.func @transform_3(%arg0: i32, %arg1: i32) -> (i32, i32, i32) {
    %c0_i32 = arith.constant 0 : i32
    %c0_i32_0 = arith.constant 0 : i32
    return %arg1, %arg0, %c0_i32 : i32, i32, i32
  }
  func.func @transform_4(%arg0: i32, %arg1: i32) -> (i32, i32, i32) {
    %c0_i32 = arith.constant 0 : i32
    %c0_i32_0 = arith.constant 0 : i32
    return %arg1, %arg0, %c0_i32 : i32, i32, i32
  }
  func.func @transform_5(%arg0: i32, %arg1: i32) -> (i32, i32, i32) {
    %c0_i32 = arith.constant 0 : i32
    %c0_i32_0 = arith.constant 0 : i32
    return %arg1, %arg0, %c0_i32 : i32, i32, i32
  }
}

</mosaic_0001>

<bundles_post_ra>
// kernel: tpu_custom_call.1
= control target key start
LH: loop header
LB: loop body
LE: loop exit
PB: predicated region body
PF: predicated region fallthrough
CT: control target
= control target key end

     0   :  { %11 = vsyncpa [#allocation3], 0  ;;  %s541_s0 = inlined_call_operand.hbm [shape: f32[64,128], index: 0, kind: input, shape index: {}]   ;;  %s542_s1 = inlined_call_operand.hbm [shape: f32[64,128], index: 1, kind: input, shape index: {}]   ;;  %s543_s2 = inlined_call_operand.hbm [shape: f32[1,64,128], index: 2, kind: input, shape index: {}]   ;;  %s544_s3 = inlined_call_operand.hbm [shape: f32[1,64,128], index: 3, kind: input, shape index: {}]   ;;  %s545_s4 = inlined_call_operand.hbm [shape: f32[1,64,128], index: 4, kind: output, shape index: {0}]   ;;  %s546_s5 = inlined_call_operand.hbm [shape: f32[1,64,128], index: 5, kind: output, shape index: {1}]  }
   0x1   :  { %12 = vsyncpa [#allocation6], 0 }
   0x2   :  { %13 = vsyncpa [#allocation9], 0 }
   0x3   :  { %14 = vsyncpa [#allocation4], 0 }
   0x4   :  { %15 = vsyncpa [#allocation12], 0  ;;  %s33_s20 = sshll.u32 %s542_s1, 4  ;;  %s414_s21 = smov [#allocation5]   ;;  %s34_s20 = int_to_ptr.hbm [resolvable:$true] %s33_s20 }
   0x5   :  { %s35_s22 = sshll.u32 %s414_s21, 4  ;;  %s20_s25 = sshll.u32 %s541_s0, 4  ;;  %s36_s22 = int_to_ptr.vmem [resolvable:$true] %s35_s22  ;;  %s21_s25 = int_to_ptr.hbm [resolvable:$true] %s20_s25 }
   0x6   :  { %s415_s26 = smov 128   ;;  %s416_s27 = smov 8  }
   0x7   :  { %41 = dma.hbm_to_vmem [thread:$0]  %s34_s20, 1024, %s36_s22, [#allocation6], %s415_s26, %s415_s26, %s416_s27  }
   0x8   :  { %s417_s28 = smov [#allocation2]   ;;  %s46_s1 = sshll.u32 %s543_s2, 4  ;;  %s47_s1 = int_to_ptr.hbm [resolvable:$true] %s46_s1 }
   0x9   :  { %s22_s29 = sshll.u32 %s417_s28, 4  ;;  %s59_s8 = sshll.u32 %s544_s3, 4  ;;  %s23_s29 = int_to_ptr.vmem [resolvable:$true] %s22_s29  ;;  %s60_s8 = int_to_ptr.hbm [resolvable:$true] %s59_s8 }
   0xa   :  { %28 = dma.hbm_to_vmem [thread:$0]  %s21_s25, 1024, %s23_s29, [#allocation3], %s415_s26, %s415_s26, %s416_s27  }
   0xb   :  { %s418_s9 = smov [#allocation7]   ;;  %s419_s11 = smov [#allocation8]  }
   0xc   :  { %s48_s10 = sshll.u32 %s418_s9, 4  ;;  %s61_s2 = sshll.u32 %s419_s11, 4  ;;  %s49_s10 = int_to_ptr.vmem [resolvable:$true] %s48_s10  ;;  %s62_s2 = int_to_ptr.vmem [resolvable:$true] %s61_s2 }
   0xd   :  { %54 = dma.hbm_to_vmem [thread:$0]  %s47_s1, 1024, %s49_s10, [#allocation6], %s415_s26, %s415_s26, %s416_s27  }
   0xe   :  { %67 = dma.hbm_to_vmem [thread:$0]  %s60_s8, 1024, %s62_s2, [#allocation9], %s415_s26, %s415_s26, %s416_s27  }
   0xf   :  { %404 = dma.done.wait [#allocation3], 1024  }
  0x10   :  { %405 = vsyncadd [#allocation3], 4294966272 }
  0x11   :  { %406 = dma.done.wait [#allocation6], 2048  }
  0x12   :  { %407 = vsyncadd [#allocation6], 4294965248 }
  0x13   :  { %408 = dma.done.wait [#allocation9], 1024  }
  0x14   :  { %409 = vsyncadd [#allocation9], 4294966272  ;;  %v100_v0 = vld [vmem:[#allocation7] sm:$0xff]  ;;  %v102_v1 = vld [vmem:[#allocation7 + $0x10] sm:$0xff]  ;;  %s420_s3 = smov 64   ;;  %s421_s12 = smov [#allocation10]  }
  0x15   :  { %124 = vrot.lane.b32.xlu0 %v100_v0, %s420_s3  ;;  %128 = vrot.lane.b32.xlu1 %v102_v1, %s420_s3  ;;  %v104_v2 = vld [vmem:[#allocation7 + $0x20] sm:$0xff]  ;;  %v477_v3 = vld [vmem:[#allocation7 + $0x8] sm:$0xff]  ;;  %v479_v4 = vld [vmem:[#allocation7 + $0x18] sm:$0xff]  ;;  %s216_s13 = sshll.u32 %s421_s12, 4  ;;  %s218_s16 = sshll.u32 %s545_s4, 4  ;;  %s217_s13 = int_to_ptr.vmem [resolvable:$true] %s216_s13  ;;  %s219_s16 = int_to_ptr.hbm [resolvable:$true] %s218_s16 }
  0x16   :  { %132 = vrot.lane.b32.xlu2 %v104_v2, %s420_s3  ;;  %v105_v5 = vld [vmem:[#allocation7 + $0x28] sm:$0xff]  ;;  %v483_v6 = vld [vmem:[#allocation7 + $0x30] sm:$0xff]  ;;  %v485_v7 = vld [vmem:[#allocation7 + $0x38] sm:$0xff]  ;;  %s422_s4 = smov [#allocation11]   ;;  %s231_s20 = sshll.u32 %s546_s5, 4  ;;  %s232_s20 = int_to_ptr.hbm [resolvable:$true] %s231_s20 }
  0x17   :  { %v108_v8 = vld [vmem:[#allocation8] sm:$0xff]  ;;  %v489_v9 = vld [vmem:[#allocation8 + $0x8] sm:$0xff]  ;;  %v491_v10 = vld [vmem:[#allocation8 + $0x10] sm:$0xff]  ;;  %s229_s17 = sshll.u32 %s422_s4, 4  ;;  %s230_s17 = int_to_ptr.vmem [resolvable:$true] %s229_s17 }
  0x18   :  { %v111_v11 = vld [vmem:[#allocation8 + $0x18] sm:$0xff]  ;;  %v495_v12 = vld [vmem:[#allocation8 + $0x20] sm:$0xff]  ;;  %v497_v13 = vld [vmem:[#allocation8 + $0x28] sm:$0xff] }
  0x19   :  { %v114_v14 = vld [vmem:[#allocation8 + $0x30] sm:$0xff]  ;;  %v501_v15 = vld [vmem:[#allocation8 + $0x38] sm:$0xff]  ;;  %v504_v16 = vld [vmem:[#allocation2 + $0x20] sm:$0xff] }
  0x1a   :  { %v506_v17 = vld [vmem:[#allocation5 + $0x20] sm:$0xff]  ;;  %v120_v18 = vmul.f32 %v104_v2, %v504_v16  ;;  %v510_v22 = vld [vmem:[#allocation2 + $0x28] sm:$0xff]  ;;  %v86_v30 = vld [vmem:[#allocation2 + $0x10] sm:$0xff] }
  0x1b   :  { %v512_v23 = vld [vmem:[#allocation5 + $0x28] sm:$0xff]  ;;  %v121_v24 = vmul.f32 %v105_v5, %v510_v22  ;;  %v84_v28 = vld [vmem:[#allocation2] sm:$0xff]  ;;  %v94_v34 = vld [vmem:[#allocation5 + $0x10] sm:$0xff]  ;;  %v118_v36 = vmul.f32 %v102_v1, %v86_v30 }
  0x1c   :  { %v164_v29 = vmul.f32 %v108_v8, %v84_v28  ;;  %v92_v31 = vld [vmem:[#allocation5] sm:$0xff]  ;;  %v116_v35 = vmul.f32 %v100_v0, %v84_v28  ;;  %v87_v42 = vld [vmem:[#allocation2 + $0x18] sm:$0xff]  ;;  %v85_v46 = vld [vmem:[#allocation2 + $0x8] sm:$0xff] }
  0x1d   :  { %126 = vrot.lane.b32.xlu0 %v477_v3, %s420_s3  ;;  %130 = vrot.lane.b32.xlu1 %v479_v4, %s420_s3  ;;  %v167_v43 = vmul.f32 %v111_v11, %v87_v42  ;;  %v95_v47 = vld [vmem:[#allocation5 + $0x18] sm:$0xff]  ;;  %v93_v50 = vld [vmem:[#allocation5 + $0x8] sm:$0xff]  ;;  %v117_v51 = vmul.f32 %v477_v3, %v85_v46  ;;  %v119_v52 = vmul.f32 %v479_v4, %v87_v42  ;;  %v90_v58 = vld [vmem:[#allocation2 + $0x30] sm:$0xff] }
  0x1e   :  { %134 = vrot.lane.b32.xlu2 %v105_v5, %s420_s3  ;;  %v170_v59 = vmul.f32 %v114_v14, %v90_v58  ;;  %v91_v62 = vld [vmem:[#allocation2 + $0x38] sm:$0xff]  ;;  %v98_v63 = vld [vmem:[#allocation5 + $0x30] sm:$0xff]  ;;  %v122_v3 = vmul.f32 %v483_v6, %v90_v58 }
  0x1f   :  { %v99_v2 = vld [vmem:[#allocation5 + $0x38] sm:$0xff]  ;;  %v123_v4 = vmul.f32 %v485_v7, %v91_v62 }
  0x25   :  { %136 = vrot.lane.b32.xlu0 %v483_v6, %s420_s3  ;;  %138 = vrot.lane.b32.xlu1 %v485_v7, %s420_s3  ;;  %v165_v6 = vmul.f32 %v489_v9, %v85_v46  ;;  %v166_v7 = vmul.f32 %v491_v10, %v86_v30 }
  0x26   :  { %172 = vrot.lane.b32.xlu2 %v108_v8, %s420_s3 }
  0x2d   :  { %174 = vrot.lane.b32.xlu0 %v489_v9, %s420_s3  ;;  %176 = vrot.lane.b32.xlu1 %v491_v10, %s420_s3  ;;  %v169_v9 = vmul.f32 %v497_v13, %v510_v22 }
  0x2e   :  { %178 = vrot.lane.b32.xlu2 %v111_v11, %s420_s3 }
  0x35   :  { %180 = vrot.lane.b32.xlu0 %v495_v12, %s420_s3  ;;  %182 = vrot.lane.b32.xlu1 %v497_v13, %s420_s3 }
  0x36   :  { %184 = vrot.lane.b32.xlu2 %v114_v14, %s420_s3 }
  0x3d   :  { %186 = vrot.lane.b32.xlu0 %v501_v15, %s420_s3 }
  0x70   :  { %v133_v19 = vpop.permute.xlu2 %132 }
  0x71   :  { %v144_v20 = vmul.f32 %v133_v19, %v506_v17 }
  0x73   :  { %v152_v21 = vadd.f32 %v144_v20, %v120_v18 }
  0x75   :  { %160 = vst [vmem:[#allocation10 + $0x20] sm:$0xff] %v152_v21 }
  0x78   :  { %v135_v25 = vpop.permute.xlu2 %134 }
  0x79   :  { %v145_v26 = vmul.f32 %v135_v25, %v512_v23 }
  0x7b   :  { %v153_v27 = vadd.f32 %v145_v26, %v121_v24 }
  0x7d   :  { %161 = vst [vmem:[#allocation10 + $0x28] sm:$0xff] %v153_v27 }
  0x80   :  { %v173_v32 = vpop.permute.xlu2 %172 }
  0x81   :  { %v188_v33 = vmul.f32 %v173_v32, %v92_v31 }
  0x83   :  { %v196_v37 = vadd.f32 %v188_v33, %v164_v29  ;;  %v168_v29 = vmul.f32 %v495_v12, %v504_v16 }
  0x85   :  { %204 = vst [vmem:[#allocation11] sm:$0xff] %v196_v37 }
  0x87   :  { %v125_v38 = vpop.permute.xlu0 %124  ;;  %v129_v39 = vpop.permute.xlu1 %128 }
  0x88   :  { %v140_v40 = vmul.f32 %v125_v38, %v92_v31  ;;  %v142_v41 = vmul.f32 %v129_v39, %v94_v34  ;;  %v179_v48 = vpop.permute.xlu2 %178 }
  0x89   :  { %v191_v49 = vmul.f32 %v179_v48, %v95_v47 }
  0x8a   :  { %v148_v44 = vadd.f32 %v140_v40, %v116_v35  ;;  %v150_v45 = vadd.f32 %v142_v41, %v118_v36 }
  0x8b   :  { %v199_v53 = vadd.f32 %v191_v49, %v167_v43 }
  0x8c   :  { %156 = vst [vmem:[#allocation10] sm:$0xff] %v148_v44 }
  0x8d   :  { %158 = vst [vmem:[#allocation10 + $0x10] sm:$0xff] %v150_v45 }
  0x8e   :  { %207 = vst [vmem:[#allocation11 + $0x18] sm:$0xff] %v199_v53 }
  0x8f   :  { %v127_v54 = vpop.permute.xlu0 %126  ;;  %v131_v55 = vpop.permute.xlu1 %130 }
  0x90   :  { %v141_v56 = vmul.f32 %v127_v54, %v93_v50  ;;  %v143_v57 = vmul.f32 %v131_v55, %v95_v47  ;;  %v185_v0 = vpop.permute.xlu2 %184 }
  0x91   :  { %v194_v1 = vmul.f32 %v185_v0, %v98_v63 }
  0x92   :  { %v149_v60 = vadd.f32 %v141_v56, %v117_v51  ;;  %v151_v61 = vadd.f32 %v143_v57, %v119_v52 }
  0x93   :  { %v202_v5 = vadd.f32 %v194_v1, %v170_v59 }
  0x94   :  { %157 = vst [vmem:[#allocation10 + $0x8] sm:$0xff] %v149_v60 }
  0x95   :  { %159 = vst [vmem:[#allocation10 + $0x18] sm:$0xff] %v151_v61 }
  0x96   :  { %210 = vst [vmem:[#allocation11 + $0x30] sm:$0xff] %v202_v5 }
  0x97   :  { %v137_v8 = vpop.permute.xlu0 %136  ;;  %v139_v11 = vpop.permute.xlu1 %138 }
  0x98   :  { %v146_v18 = vmul.f32 %v137_v8, %v98_v63  ;;  %v147_v19 = vmul.f32 %v139_v11, %v99_v2 }
  0x9a   :  { %v154_v14 = vadd.f32 %v146_v18, %v122_v3  ;;  %v155_v20 = vadd.f32 %v147_v19, %v123_v4 }
  0x9c   :  { %162 = vst [vmem:[#allocation10 + $0x30] sm:$0xff] %v154_v14 }
  0x9d   :  { %163 = vst [vmem:[#allocation10 + $0x38] sm:$0xff] %v155_v20 }
  0x9e   :  { %224 = dma.vmem_to_hbm [thread:$0]  %s217_s13, 1024, %s219_s16, [#allocation4], %s415_s26, %s415_s26, %s416_s27  }
  0x9f   :  { %v175_v21 = vpop.permute.xlu0 %174  ;;  %v177_v24 = vpop.permute.xlu1 %176 }
  0xa0   :  { %v189_v25 = vmul.f32 %v175_v21, %v93_v50  ;;  %v190_v26 = vmul.f32 %v177_v24, %v94_v34  ;;  %v171_v34 = vmul.f32 %v501_v15, %v91_v62 }
  0xa2   :  { %v197_v27 = vadd.f32 %v189_v25, %v165_v6  ;;  %v198_v28 = vadd.f32 %v190_v26, %v166_v7 }
  0xa4   :  { %205 = vst [vmem:[#allocation11 + $0x8] sm:$0xff] %v197_v27 }
  0xa5   :  { %206 = vst [vmem:[#allocation11 + $0x10] sm:$0xff] %v198_v28 }
  0xa7   :  { %v181_v31 = vpop.permute.xlu0 %180  ;;  %v183_v10 = vpop.permute.xlu1 %182 }
  0xa8   :  { %v192_v30 = vmul.f32 %v181_v31, %v506_v17  ;;  %v193_v32 = vmul.f32 %v183_v10, %v512_v23 }
  0xaa   :  { %v200_v33 = vadd.f32 %v192_v30, %v168_v29  ;;  %v201_v35 = vadd.f32 %v193_v32, %v169_v9 }
  0xac   :  { %208 = vst [vmem:[#allocation11 + $0x20] sm:$0xff] %v200_v33 }
  0xad   :  { %209 = vst [vmem:[#allocation11 + $0x28] sm:$0xff] %v201_v35 }
  0xaf   :  { %v187_v36 = vpop.permute.xlu0 %186 }
  0xb0   :  { %v195_v12 = vmul.f32 %v187_v36, %v99_v2 }
  0xb2   :  { %v203_v13 = vadd.f32 %v195_v12, %v171_v34 }
  0xb4   :  { %211 = vst [vmem:[#allocation11 + $0x38] sm:$0xff] %v203_v13 }
  0xb5   :  { %237 = dma.vmem_to_hbm [thread:$0]  %s230_s17, 1024, %s232_s20, [#allocation12], %s415_s26, %s415_s26, %s416_s27  }
  0xb6   :  { %410 = dma.done.wait [#allocation4], 1024  }
  0xb7   :  { %411 = vsyncadd [#allocation4], 4294966272 }
  0xb8   :  { %412 = dma.done.wait [#allocation12], 1024  }
  0xb9   :  { %413 = vsyncadd [#allocation12], 4294966272 }
  0xba   :  { %246 = vsyncpa [#allocation3], 1 }
  0xbb   :  { %247 = vsyncpa [#allocation6], 1 }
  0xbc   :  { %248 = vsyncpa [#allocation9], 1 }
  0xbd   :  { %249 = vsyncpa [#allocation4], 1 }
  0xbe   :  { %250 = vsyncpa [#allocation12], 1 }

</bundles_post_ra>
